<compile_context>
chip_gen: v7x
topology: tpu7x:2x2x1
jax: 0.10.0
libtpu: 0.0.40
codegen_flags: <defaults>
</compile_context>

<pallas_src>
import jax
import jax.numpy as jnp
from jax.experimental import pallas as pl
from jax.experimental.pallas import tpu as pltpu


def _round_up(n, m):
    return ((n + m - 1) // m) * m


def _sigmoid(v):
    # single-EUP sigmoid: 0.5*tanh(0.5*v) + 0.5
    return 0.5 * jnp.tanh(0.5 * v) + 0.5


def _pack_weights(params, latent_dim, mxu_dtype):
    """Pack all weights into one MXU slab + one f32 bias/VPU-weight slab."""
    (w1, b1), (w2, b2), (wmu, bmu), (wlv, blv), (wa1, ba1), (wa2, ba2), \
        (w4, b4), (w5, b5), (w6, b6) = params
    L = latent_dim
    LANES = 128

    # fused encoder head: one (64 -> 2L) matmul
    w3 = jnp.concatenate([wmu, wlv], axis=1)          # (64, 2L)  [mu | logvar]
    b3 = jnp.concatenate([bmu, blv], axis=1)          # (1, 2L)

    # fused decoder-in + aux-hidden: [z | mu] @ blockdiag(w4, wa1)
    w_zmu = jnp.zeros((2 * L, 64 + 32), jnp.float32)
    w_zmu = w_zmu.at[:L, :64].set(w4).at[L:, 64:].set(wa1)   # (2L, 96)
    b_zmu = jnp.concatenate([b4, ba1], axis=1)               # (1, 96)

    mxu_ws = [("w1", w1), ("w2", w2), ("w3", w3), ("w_zmu", w_zmu),
              ("w5", w5), ("w6", w6)]
    offs = {}
    blocks = []
    row = 0
    for name, w in mxu_ws:
        r, c = w.shape
        assert c <= LANES, f"{name}: {c} output lanes exceed slab width"
        offs[name] = (row, r, c)
        blk = jnp.zeros((_round_up(r, 16), LANES), jnp.float32).at[:r, :c].set(w)
        blocks.append(blk)
        row += blk.shape[0]
    wslab = jnp.concatenate(blocks, axis=0).astype(mxu_dtype)   # (R, 128)

    # f32 row slab: biases + the N=1 aux weight (used on the VPU, never the MXU)
    vecs = [("b1", b1), ("b2", b2), ("b3", b3), ("b_zmu", b_zmu),
            ("b5", b5), ("b6", b6), ("ba2", ba2), ("wa2t", wa2.T)]
    boffs = {}
    brows = []
    for i, (name, v) in enumerate(vecs):
        c = v.shape[1]
        assert c <= LANES
        boffs[name] = (i, c)
        brows.append(jnp.zeros((1, LANES), jnp.float32).at[:, :c].set(v))
    bslab = jnp.concatenate(brows, axis=0)                      # (8, 128) f32

    return wslab, offs, bslab, boffs


def _make_kernel(input_dim, latent_dim, offs, boffs, mxu_dtype):
    L = latent_dim
    f32 = jnp.float32

    def kernel(xe_ref, w_ref, b_ref, out_ref):
        def W(name):                       # static Ref slice -> just the block
            r, nr, nc = offs[name]
            return w_ref[r:r + nr, 0:nc]

        def Bv(name):                      # one bias row, valid lanes only
            r, nc = boffs[name]
            return b_ref[r:r + 1, 0:nc]

        def dot(a, name):                  # MXU matmul, f32 accumulate
            return jnp.dot(a.astype(mxu_dtype), W(name),
                           preferred_element_type=f32)

        xe = xe_ref[...]
        x = xe[:, :input_dim]
        eps = xe[:, input_dim:input_dim + L]

        # ---- encode ----
        h = jnp.maximum(dot(x, "w1") + Bv("b1"), 0.0)           # (TB, 128)
        h = jnp.maximum(dot(h, "w2") + Bv("b2"), 0.0)           # (TB, 64)
        ml = dot(h, "w3") + Bv("b3")                            # (TB, 2L) [mu|logvar]
        mu = ml[:, :L]
        logvar = ml[:, L:]

        # ---- reparameterize: z = mu + eps * exp(0.5 * logvar) ----
        z = mu + eps * jnp.exp(0.5 * logvar)

        # ---- decoder layer 1 + aux hidden, fused block-diag matmul on MXU ----
        zmu = jnp.concatenate([z, mu], axis=1)                  # (TB, 2L)
        da = jnp.maximum(dot(zmu, "w_zmu") + Bv("b_zmu"), 0.0)  # (TB, 96)
        d = da[:, :64]
        a = da[:, 64:]

        # ---- rest of the decoder ----
        d = jnp.maximum(dot(d, "w5") + Bv("b5"), 0.0)           # (TB, 128)
        recon = _sigmoid(dot(d, "w6") + Bv("b6"))               # (TB, input_dim)

        # ---- aux head (N=1): elementwise mul + lane reduction on VPU/XLU ----
        logit = jnp.sum(a * Bv("wa2t"), axis=1, keepdims=True) + Bv("ba2")
        s = _sigmoid(logit)                                     # (TB, 1)

        # ---- single coalesced store: [recon | mu | logvar | s] (ml reused) ----
        out_ref[...] = jnp.concatenate([recon, ml, s], axis=1)

    return kernel


def icvae_forward(x, eps, params, *, tile_b=1024, mxu_dtype=jnp.float32):
    B, input_dim = x.shape
    latent_dim = eps.shape[1]
    assert eps.shape[0] == B
    assert input_dim <= 128, "fc6 output width must fit one 128-lane slab"
    W_out = input_dim + 2 * latent_dim + 1      # recon | mu | logvar | sigmoid(aux)

    wslab, offs, bslab, boffs = _pack_weights(params, latent_dim, mxu_dtype)

    # Single packed activation stream [x | eps]: one DMA per grid step.
    xe = jnp.concatenate([x, eps], axis=1)
    D_in = input_dim + latent_dim

    # Batch tiling: big tiles for the HBM roofline, but >=2 grid steps whenever
    # there is enough work so v7x's second TensorCore is used.
    tile_b = _round_up(max(tile_b, 8), 8)
    if B <= 16:
        TB = B                                           # single tiny tile
    else:
        TB = min(tile_b, _round_up(pl.cdiv(B, 2), 8))
    grid_b = pl.cdiv(B, TB)
    Bp = grid_b * TB
    if Bp != B:                                          # ragged tail -> zero pad
        xe = jnp.pad(xe, ((0, Bp - B), (0, 0)))

    kernel = _make_kernel(input_dim, latent_dim, offs, boffs, mxu_dtype)

    slab = pl.pallas_call(
        kernel,
        out_shape=jax.ShapeDtypeStruct((Bp, W_out), jnp.float32),
        grid=(grid_b,),
        in_specs=[
            pl.BlockSpec((TB, D_in), lambda i: (i, 0)),          # [x | eps]
            pl.BlockSpec(wslab.shape, lambda i: (0, 0)),         # VMEM-resident weights
            pl.BlockSpec(bslab.shape, lambda i: (0, 0)),         # biases + wa2^T
        ],
        out_specs=pl.BlockSpec((TB, W_out), lambda i: (i, 0)),
        compiler_params=pltpu.CompilerParams(
            dimension_semantics=("parallel",)),
    )(xe, wslab, bslab)

    recon = slab[:B, :input_dim]
    mu = slab[:B, input_dim:input_dim + latent_dim]
    logvar = slab[:B, input_dim + latent_dim:input_dim + 2 * latent_dim]
    kl_w = jnp.mean(slab[:B, -1])
    return recon, mu, logvar, kl_w


def make_linear_params(key, in_dim, out_dim, scale=0.1):
    kw, kb = jax.random.split(key)
    w = scale * jax.random.normal(kw, (in_dim, out_dim), jnp.float32)  # pre-transposed
    b = scale * jax.random.normal(kb, (1, out_dim), jnp.float32)
    return w, b


def reference_forward(x, eps, params):
    (w1, b1), (w2, b2), (wmu, bmu), (wlv, blv), (wa1, ba1), (wa2, ba2), \
        (w4, b4), (w5, b5), (w6, b6) = params
    h = jax.nn.relu(x @ w1 + b1)
    h = jax.nn.relu(h @ w2 + b2)
    mu = h @ wmu + bmu
    logvar = h @ wlv + blv
    z = mu + eps * jnp.exp(0.5 * logvar)
    d = jax.nn.relu(z @ w4 + b4)
    d = jax.nn.relu(d @ w5 + b5)
    recon = jax.nn.sigmoid(d @ w6 + b6)
    a = jax.nn.relu(mu @ wa1 + ba1)
    kl_w = jnp.mean(jax.nn.sigmoid(a @ wa2 + ba2))
    return recon, mu, logvar, kl_w


if __name__ == "__main__":
    input_dim = 16
    latent_dim = 2

    root = jax.random.PRNGKey(0)
    keys = jax.random.split(root, 16)

    # Deterministic parameter init (shapes follow ICVAE.__init__).
    params = [
        make_linear_params(keys[0], input_dim, 128),   # fc1
        make_linear_params(keys[1], 128, 64),          # fc2
        make_linear_params(keys[2], 64, latent_dim),   # fc3_mu
        make_linear_params(keys[3], 64, latent_dim),   # fc3_logvar
        make_linear_params(keys[4], latent_dim, 32),   # aux_network[0]
        make_linear_params(keys[5], 32, 1),            # aux_network[2]
        make_linear_params(keys[6], latent_dim, 64),   # fc4
        make_linear_params(keys[7], 64, 128),          # fc5
        make_linear_params(keys[8], 128, input_dim),   # fc6
    ]

    # ---- case 1: tiny single-tile batch, f32 MXU operands (tight parity) ----
    B = 8
    x = jax.random.uniform(keys[9], (B, input_dim), jnp.float32)       # data in [0,1]
    # TODO(synk): torch.randn_like is replaced by an explicit eps input (could be
    # generated in-kernel via pltpu.prng_seed/prng_random_bits + Box-Muller).
    eps = jax.random.normal(keys[10], (B, latent_dim), jnp.float32)

    recon, mu, logvar, kl_w = icvae_forward(x, eps, params)
    jax.block_until_ready((recon, mu, logvar, kl_w))

    r_recon, r_mu, r_logvar, r_klw = reference_forward(x, eps, params)
    assert jnp.allclose(recon, r_recon, atol=1e-5), "recon mismatch"
    assert jnp.allclose(mu, r_mu, atol=1e-5), "mu mismatch"
    assert jnp.allclose(logvar, r_logvar, atol=1e-5), "logvar mismatch"
    assert jnp.allclose(kl_w, r_klw, atol=1e-5), "kl_w mismatch"

    # ---- case 2: ragged batch, multi-step grid (B=20, TB=16 -> 2 steps + pad) ----
    B2 = 20
    x2 = jax.random.uniform(keys[11], (B2, input_dim), jnp.float32)
    eps2 = jax.random.normal(keys[12], (B2, latent_dim), jnp.float32)
    recon2, mu2, logvar2, kl_w2 = icvae_forward(x2, eps2, params, tile_b=16)
    jax.block_until_ready((recon2, mu2, logvar2, kl_w2))
    rr2, rm2, rl2, rk2 = reference_forward(x2, eps2, params)
    assert jnp.allclose(recon2, rr2, atol=1e-5), "ragged recon mismatch"
    assert jnp.allclose(mu2, rm2, atol=1e-5), "ragged mu mismatch"
    assert jnp.allclose(logvar2, rl2, atol=1e-5), "ragged logvar mismatch"
    assert jnp.allclose(kl_w2, rk2, atol=1e-5), "ragged kl_w mismatch"

    # ---- case 3: bf16 MXU-operand fast path (loose parity vs f32 reference) ----
    recon3, mu3, logvar3, kl_w3 = icvae_forward(x, eps, params,
                                                mxu_dtype=jnp.bfloat16)
    jax.block_until_ready((recon3, mu3, logvar3, kl_w3))
    assert jnp.allclose(recon3, r_recon, atol=2e-2), "bf16 recon mismatch"
    assert jnp.allclose(mu3, r_mu, atol=2e-2), "bf16 mu mismatch"
    assert jnp.allclose(logvar3, r_logvar, atol=2e-2), "bf16 logvar mismatch"
    assert jnp.allclose(kl_w3, r_klw, atol=2e-2), "bf16 kl_w mismatch"

    print("KERNEL_OK")
</pallas_src>

<mosaic_0001>
module attributes {stable_mosaic.version = 11 : i64} {
  func.func @kernel(%arg0: i32, %arg1: memref<8x18xf32, #tpu.memory_space<vmem>>, %arg2: memref<416x128xf32, #tpu.memory_space<vmem>>, %arg3: memref<8x128xf32, #tpu.memory_space<vmem>>, %arg4: memref<8x21xf32, #tpu.memory_space<vmem>>) attributes {dimension_semantics = [#tpu.dimension_semantics<parallel>], iteration_bounds = array<i64: 1>, scalar_prefetch = 0 : i64, scratch_operands = 0 : i64, tpu.core_type = #tpu.core_type<tc>, window_params = [{transform_indices = @transform_0, window_bounds = array<i64: 8, 18>}, {pipeline_mode = #tpu.pipeline_mode<synchronous>, transform_indices = @transform_1, window_bounds = array<i64: 416, 128>}, {pipeline_mode = #tpu.pipeline_mode<synchronous>, transform_indices = @transform_2, window_bounds = array<i64: 8, 128>}, {transform_indices = @transform_3, window_bounds = array<i64: 8, 21>}]} {
    %c0 = arith.constant 0 : index
    %c0_0 = arith.constant 0 : index
    %0 = vector.load %arg1[%c0, %c0_0] : memref<8x18xf32, #tpu.memory_space<vmem>>, vector<8x18xf32>
    %1 = vector.extract_strided_slice %0 {offsets = [0, 0], sizes = [8, 16], strides = [1, 1]} : vector<8x18xf32> to vector<8x16xf32>
    %2 = vector.extract_strided_slice %0 {offsets = [0, 16], sizes = [8, 2], strides = [1, 1]} : vector<8x18xf32> to vector<8x2xf32>
    %c0_1 = arith.constant 0 : index
    %c0_2 = arith.constant 0 : index
    %3 = vector.load %arg2[%c0_1, %c0_2] : memref<416x128xf32, #tpu.memory_space<vmem>>, vector<16x128xf32>
    %cst = arith.constant dense<0.000000e+00> : vector<8x128xf32>
    %4 = tpu.matmul %1, %3, %cst {dimension_numbers = #tpu.dot_dimension_numbers<[1], [0], [0], [1], [0, 0, 1, 1], [], []>} : vector<8x16xf32>, vector<16x128xf32>, vector<8x128xf32> -> vector<8x128xf32>
    %c0_3 = arith.constant 0 : index
    %c0_4 = arith.constant 0 : index
    %5 = vector.load %arg3[%c0_3, %c0_4] : memref<8x128xf32, #tpu.memory_space<vmem>>, vector<1x128xf32>
    %6 = vector.broadcast %5 : vector<1x128xf32> to vector<8x128xf32>
    %7 = arith.addf %4, %6 : vector<8x128xf32>
    %cst_5 = arith.constant 0.000000e+00 : f32
    %8 = vector.broadcast %cst_5 : f32 to vector<8x128xf32>
    %9 = arith.maximumf %7, %8 : vector<8x128xf32>
    %c16 = arith.constant 16 : index
    %c0_6 = arith.constant 0 : index
    %10 = vector.load %arg2[%c16, %c0_6] : memref<416x128xf32, #tpu.memory_space<vmem>>, vector<128x64xf32>
    %cst_7 = arith.constant dense<0.000000e+00> : vector<8x64xf32>
    %11 = tpu.matmul %9, %10, %cst_7 {dimension_numbers = #tpu.dot_dimension_numbers<[1], [0], [0], [1], [0, 0, 1, 1], [], []>} : vector<8x128xf32>, vector<128x64xf32>, vector<8x64xf32> -> vector<8x64xf32>
    %c1 = arith.constant 1 : index
    %c0_8 = arith.constant 0 : index
    %12 = vector.load %arg3[%c1, %c0_8] : memref<8x128xf32, #tpu.memory_space<vmem>>, vector<1x64xf32>
    %13 = vector.broadcast %12 : vector<1x64xf32> to vector<8x64xf32>
    %14 = arith.addf %11, %13 : vector<8x64xf32>
    %cst_9 = arith.constant 0.000000e+00 : f32
    %15 = vector.broadcast %cst_9 : f32 to vector<8x64xf32>
    %16 = arith.maximumf %14, %15 : vector<8x64xf32>
    %c144 = arith.constant 144 : index
    %c0_10 = arith.constant 0 : index
    %17 = vector.load %arg2[%c144, %c0_10] : memref<416x128xf32, #tpu.memory_space<vmem>>, vector<64x4xf32>
    %cst_11 = arith.constant dense<0.000000e+00> : vector<8x4xf32>
    %18 = tpu.matmul %16, %17, %cst_11 {dimension_numbers = #tpu.dot_dimension_numbers<[1], [0], [0], [1], [0, 0, 1, 1], [], []>} : vector<8x64xf32>, vector<64x4xf32>, vector<8x4xf32> -> vector<8x4xf32>
    %c2 = arith.constant 2 : index
    %c0_12 = arith.constant 0 : index
    %19 = vector.load %arg3[%c2, %c0_12] : memref<8x128xf32, #tpu.memory_space<vmem>>, vector<1x4xf32>
    %20 = vector.broadcast %19 : vector<1x4xf32> to vector<8x4xf32>
    %21 = arith.addf %18, %20 : vector<8x4xf32>
    %22 = vector.extract_strided_slice %21 {offsets = [0, 0], sizes = [8, 2], strides = [1, 1]} : vector<8x4xf32> to vector<8x2xf32>
    %23 = vector.extract_strided_slice %21 {offsets = [0, 2], sizes = [8, 2], strides = [1, 1]} : vector<8x4xf32> to vector<8x2xf32>
    %cst_13 = arith.constant 5.000000e-01 : f32
    %24 = vector.broadcast %cst_13 : f32 to vector<8x2xf32>
    %25 = arith.mulf %24, %23 : vector<8x2xf32>
    %26 = math.exp %25 : vector<8x2xf32>
    %27 = arith.mulf %2, %26 : vector<8x2xf32>
    %28 = arith.addf %22, %27 : vector<8x2xf32>
    %29 = tpu.concatenate %28, %22 in 1 : vector<8x2xf32>, vector<8x2xf32> -> vector<8x4xf32>
    %c208 = arith.constant 208 : index
    %c0_14 = arith.constant 0 : index
    %30 = vector.load %arg2[%c208, %c0_14] : memref<416x128xf32, #tpu.memory_space<vmem>>, vector<4x96xf32>
    %cst_15 = arith.constant dense<0.000000e+00> : vector<8x96xf32>
    %31 = tpu.matmul %29, %30, %cst_15 {dimension_numbers = #tpu.dot_dimension_numbers<[1], [0], [0], [1], [0, 0, 1, 1], [], []>} : vector<8x4xf32>, vector<4x96xf32>, vector<8x96xf32> -> vector<8x96xf32>
    %c3 = arith.constant 3 : index
    %c0_16 = arith.constant 0 : index
    %32 = vector.load %arg3[%c3, %c0_16] : memref<8x128xf32, #tpu.memory_space<vmem>>, vector<1x96xf32>
    %33 = vector.broadcast %32 : vector<1x96xf32> to vector<8x96xf32>
    %34 = arith.addf %31, %33 : vector<8x96xf32>
    %cst_17 = arith.constant 0.000000e+00 : f32
    %35 = vector.broadcast %cst_17 : f32 to vector<8x96xf32>
    %36 = arith.maximumf %34, %35 : vector<8x96xf32>
    %37 = vector.extract_strided_slice %36 {offsets = [0, 0], sizes = [8, 64], strides = [1, 1]} : vector<8x96xf32> to vector<8x64xf32>
    %38 = vector.extract_strided_slice %36 {offsets = [0, 64], sizes = [8, 32], strides = [1, 1]} : vector<8x96xf32> to vector<8x32xf32>
    %c224 = arith.constant 224 : index
    %c0_18 = arith.constant 0 : index
    %39 = vector.load %arg2[%c224, %c0_18] : memref<416x128xf32, #tpu.memory_space<vmem>>, vector<64x128xf32>
    %cst_19 = arith.constant dense<0.000000e+00> : vector<8x128xf32>
    %40 = tpu.matmul %37, %39, %cst_19 {dimension_numbers = #tpu.dot_dimension_numbers<[1], [0], [0], [1], [0, 0, 1, 1], [], []>} : vector<8x64xf32>, vector<64x128xf32>, vector<8x128xf32> -> vector<8x128xf32>
    %c4 = arith.constant 4 : index
    %c0_20 = arith.constant 0 : index
    %41 = vector.load %arg3[%c4, %c0_20] : memref<8x128xf32, #tpu.memory_space<vmem>>, vector<1x128xf32>
    %42 = vector.broadcast %41 : vector<1x128xf32> to vector<8x128xf32>
    %43 = arith.addf %40, %42 : vector<8x128xf32>
    %cst_21 = arith.constant 0.000000e+00 : f32
    %44 = vector.broadcast %cst_21 : f32 to vector<8x128xf32>
    %45 = arith.maximumf %43, %44 : vector<8x128xf32>
    %c288 = arith.constant 288 : index
    %c0_22 = arith.constant 0 : index
    %46 = vector.load %arg2[%c288, %c0_22] : memref<416x128xf32, #tpu.memory_space<vmem>>, vector<128x16xf32>
    %cst_23 = arith.constant dense<0.000000e+00> : vector<8x16xf32>
    %47 = tpu.matmul %45, %46, %cst_23 {dimension_numbers = #tpu.dot_dimension_numbers<[1], [0], [0], [1], [0, 0, 1, 1], [], []>} : vector<8x128xf32>, vector<128x16xf32>, vector<8x16xf32> -> vector<8x16xf32>
    %c5 = arith.constant 5 : index
    %c0_24 = arith.constant 0 : index
    %48 = vector.load %arg3[%c5, %c0_24] : memref<8x128xf32, #tpu.memory_space<vmem>>, vector<1x16xf32>
    %49 = vector.broadcast %48 : vector<1x16xf32> to vector<8x16xf32>
    %50 = arith.addf %47, %49 : vector<8x16xf32>
    %cst_25 = arith.constant 5.000000e-01 : f32
    %51 = vector.broadcast %cst_25 : f32 to vector<8x16xf32>
    %52 = arith.mulf %51, %50 : vector<8x16xf32>
    %53 = math.tanh %52 : vector<8x16xf32>
    %cst_26 = arith.constant 5.000000e-01 : f32
    %54 = vector.broadcast %cst_26 : f32 to vector<8x16xf32>
    %55 = arith.mulf %54, %53 : vector<8x16xf32>
    %cst_27 = arith.constant 5.000000e-01 : f32
    %56 = vector.broadcast %cst_27 : f32 to vector<8x16xf32>
    %57 = arith.addf %55, %56 : vector<8x16xf32>
    %c7 = arith.constant 7 : index
    %c0_28 = arith.constant 0 : index
    %58 = vector.load %arg3[%c7, %c0_28] : memref<8x128xf32, #tpu.memory_space<vmem>>, vector<1x32xf32>
    %59 = vector.broadcast %58 : vector<1x32xf32> to vector<8x32xf32>
    %60 = arith.mulf %38, %59 : vector<8x32xf32>
    %cst_29 = arith.constant dense<0.000000e+00> : vector<8xf32>
    %61 = vector.multi_reduction <add>, %60, %cst_29 [1] : vector<8x32xf32> to vector<8xf32>
    %62 = vector.shape_cast %61 : vector<8xf32> to vector<8x1xf32>
    %c6 = arith.constant 6 : index
    %c0_30 = arith.constant 0 : index
    %63 = vector.load %arg3[%c6, %c0_30] : memref<8x128xf32, #tpu.memory_space<vmem>>, vector<1x1xf32>
    %64 = vector.broadcast %63 : vector<1x1xf32> to vector<8x1xf32>
    %65 = arith.addf %62, %64 : vector<8x1xf32>
    %cst_31 = arith.constant 5.000000e-01 : f32
    %66 = vector.broadcast %cst_31 : f32 to vector<8x1xf32>
    %67 = arith.mulf %66, %65 : vector<8x1xf32>
    %68 = math.tanh %67 : vector<8x1xf32>
    %cst_32 = arith.constant 5.000000e-01 : f32
    %69 = vector.broadcast %cst_32 : f32 to vector<8x1xf32>
    %70 = arith.mulf %69, %68 : vector<8x1xf32>
    %cst_33 = arith.constant 5.000000e-01 : f32
    %71 = vector.broadcast %cst_33 : f32 to vector<8x1xf32>
    %72 = arith.addf %70, %71 : vector<8x1xf32>
    %73 = tpu.concatenate %57, %21, %72 in 1 : vector<8x16xf32>, vector<8x4xf32>, vector<8x1xf32> -> vector<8x21xf32>
    %c0_34 = arith.constant 0 : index
    %c0_35 = arith.constant 0 : index
    %74 = vector.load %arg4[%c0_34, %c0_35] : memref<8x21xf32, #tpu.memory_space<vmem>>, vector<8x21xf32>
    tpu.vector_store %arg4[%c0_34, %c0_35], %73 {strides = array<i32>} : memref<8x21xf32, #tpu.memory_space<vmem>>, vector<8x21xf32>,
    return
  }
  func.func @transform_0(%arg0: i32) -> (i32, i32) {
    %c0_i32 = arith.constant 0 : i32
    %c0_i32_0 = arith.constant 0 : i32
    return %arg0, %c0_i32 : i32, i32
  }
  func.func @transform_1(%arg0: i32) -> (i32, i32) {
    %c0_i32 = arith.constant 0 : i32
    %c0_i32_0 = arith.constant 0 : i32
    %c0_i32_1 = arith.constant 0 : i32
    return %c0_i32, %c0_i32_0 : i32, i32
  }
  func.func @transform_2(%arg0: i32) -> (i32, i32) {
    %c0_i32 = arith.constant 0 : i32
    %c0_i32_0 = arith.constant 0 : i32
    %c0_i32_1 = arith.constant 0 : i32
    return %c0_i32, %c0_i32_0 : i32, i32
  }
  func.func @transform_3(%arg0: i32) -> (i32, i32) {
    %c0_i32 = arith.constant 0 : i32
    %c0_i32_0 = arith.constant 0 : i32
    return %arg0, %c0_i32 : i32, i32
  }
}

</mosaic_0001>

<bundles_post_ra>
// kernel: tpu_custom_call.1
= control target key start
LH: loop header
LB: loop body
LE: loop exit
PB: predicated region body
PF: predicated region fallthrough
CT: control target
= control target key end

     0   :  { %8 = vsyncpa [#allocation3], 0  ;;  %s1173_s0 = inlined_call_operand.hbm [shape: f32[8,18], index: 0, kind: input, shape index: {}]   ;;  %s1174_s1 = inlined_call_operand.hbm [shape: f32[416,128], index: 1, kind: input, shape index: {}]   ;;  %s1175_s2 = inlined_call_operand.hbm [shape: f32[8,128], index: 2, kind: input, shape index: {}]   ;;  %s1176_s3 = inlined_call_operand.hbm [shape: f32[8,21], index: 3, kind: output, shape index: {}]  }
   0x1   :  { %9 = vsyncpa [#allocation6], 0 }
   0x2   :  { %10 = vsyncpa [#allocation4], 0  ;;  %s1036_s12 = smov [#allocation5]   ;;  %s942_s16 = scalar_lea.hbm %s1174_s1, 6656 }
   0x3   :  { %s26_s13 = sshll.u32 %s1036_s12, 4  ;;  %p943_p0 = scmp.ne.s32.totalorder %s1174_s1, %s942_s16  ;;  %s27_s13 = int_to_ptr.vmem [resolvable:$true] %s26_s13 }
   0x4   :  { %p946_p1 = scmp.lt.u32.totalorder %s942_s16, %s1174_s1 }
   0x6   :  { %p948_p2 = pnand %p946_p1, %p943_p0 }
   0x8   :  { %951 = shalt.err (!%p948_p2)
}
   0x9   :  { %s952_s21 = scalar_lea.vmem %s27_s13, 6656  ;;  %p957_p4 = scmp.lt.s32.totalorder %s27_s13, %s27_s13 }
   0xa   :  { %p953_p3 = scmp.ne.s32.totalorder %s27_s13, %s952_s21  ;;  %p958_p5 = scmp.lt.s32.totalorder %s952_s21, %s952_s21 }
   0xc   :  { %p959_p6 = por %p958_p5, %p957_p4 }
   0xe   :  { %p960_p7 = pnand %p959_p6, %p953_p3 }
  0x10   :  { %963 = shalt.err (!%p960_p7)
}
  0x11   :  { %s1037_s22 = smov 128   ;;  %s1038_s23 = smov 8  }
  0x12   :  { %32 = dma.hbm_to_vmem [thread:$0]  %s1174_s1, 6656, %s27_s13, [#allocation6], %s1037_s22, %s1037_s22, %s1038_s23  }
  0x13   :  { %s1039_s26 = smov [#allocation2]   ;;  %s1040_s28 = smov [#allocation7]  }
  0x14   :  { %s17_s27 = sshll.u32 %s1039_s26, 4  ;;  %s39_s29 = sshll.u32 %s1040_s28, 4  ;;  %s18_s27 = int_to_ptr.vmem [resolvable:$true] %s17_s27  ;;  %s40_s29 = int_to_ptr.vmem [resolvable:$true] %s39_s29 }
  0x15   :  { %s964_s5 = scalar_lea.hbm %s1173_s0, 128 }
  0x16   :  { %p965_p8 = scmp.ne.s32.totalorder %s1173_s0, %s964_s5  ;;  %p968_p9 = scmp.lt.u32.totalorder %s964_s5, %s1173_s0 }
  0x18   :  { %p970_p10 = pnand %p968_p9, %p965_p8 }
  0x1a   :  { %973 = shalt.err (!%p970_p10)
}
  0x1b   :  { %s974_s1 = scalar_lea.vmem %s18_s27, 128  ;;  %p979_p12 = scmp.lt.s32.totalorder %s18_s27, %s18_s27 }
  0x1c   :  { %p975_p11 = scmp.ne.s32.totalorder %s18_s27, %s974_s1  ;;  %p980_p13 = scmp.lt.s32.totalorder %s974_s1, %s974_s1 }
  0x1e   :  { %p981_p0 = por %p980_p13, %p979_p12 }
  0x20   :  { %p982_p1 = pnand %p981_p0, %p975_p11 }
  0x22   :  { %985 = shalt.err (!%p982_p1)
}
  0x23   :  { %20 = dma.hbm_to_vmem [thread:$0]  %s1173_s0, 128, %s18_s27, [#allocation3]  }
  0x24   :  { %s986_s14 = scalar_lea.hbm %s1175_s2, 128 }
  0x25   :  { %p987_p2 = scmp.ne.s32.totalorder %s1175_s2, %s986_s14  ;;  %p990_p3 = scmp.lt.u32.totalorder %s986_s14, %s1175_s2 }
  0x27   :  { %p992_p4 = pnand %p990_p3, %p987_p2 }
  0x29   :  { %995 = shalt.err (!%p992_p4)
}
  0x2a   :  { %s996_s19 = scalar_lea.vmem %s40_s29, 128  ;;  %p1001_p6 = scmp.lt.s32.totalorder %s40_s29, %s40_s29 }
  0x2b   :  { %p997_p5 = scmp.ne.s32.totalorder %s40_s29, %s996_s19  ;;  %p1002_p7 = scmp.lt.s32.totalorder %s996_s19, %s996_s19 }
  0x2d   :  { %p1003_p8 = por %p1002_p7, %p1001_p6 }
  0x2f   :  { %p1004_p9 = pnand %p1003_p8, %p997_p5 }
  0x31   :  { %1007 = shalt.err (!%p1004_p9)
}
  0x32   :  { %42 = dma.hbm_to_vmem [thread:$0]  %s1175_s2, 128, %s40_s29, [#allocation6]  }
  0x33   :  { %1030 = dma.done.wait [#allocation3], 128  }
  0x34   :  { %1031 = vsyncadd [#allocation3], 4294967168 }
  0x35   :  { %1032 = dma.done.wait [#allocation6], 6784  }
  0x36   :  { %1033 = vsyncadd [#allocation6], 4294960512  ;;  %v1041_v0 = vmov 0.0|0.0   ;;  %vm1042_vm0 = vmmov 0   ;;  %v1043_v1 = vmov 0.0   ;;  %v53_v2 = vld [vmem:[#allocation5] sm:$0xff] }
  0x37   :  { %846 = vmatprep.subr.bf16.mxu0 %v1041_v0  ;;  %730 = vmatprep.mubr.msk.f32.mxu0 %vm1042_vm0, %v1043_v1  ;;  %v54_v3 = vld [vmem:[#allocation5 + $0x8] sm:$0xff]  ;;  %v135_v5 = vld [vmem:[#allocation5 + $0x10] sm:$0xff]  ;;  %v136_v6 = vld [vmem:[#allocation5 + $0x18] sm:$0xff]  ;;  %vm60_vm1 = vcmask 130048   ;;  %vm240_vm2 = vcmask 523264   ;;  %s1044_s2 = smov 2  }
  0x38   :  { %849 = vmatprep.subr.bf16.mxu1 %v1041_v0  ;;  %765 = vmatprep.mubr.msk.f32.mxu1 %vm1042_vm0, %v1043_v1  ;;  %v847_v4 = vpack.c.bf16 %v54_v3, %v53_v2  ;;  %v137_v7 = vld [vmem:[#allocation5 + $0x20] sm:$0xff]  ;;  %v850_v8 = vpack.c.bf16 %v136_v6, %v135_v5  ;;  %v138_v9 = vld [vmem:[#allocation5 + $0x28] sm:$0xff]  ;;  %v1113_v10 = vld [vmem:[#allocation2] sm:$0xff]  ;;  %vm343_vm3 = vcmask 1043456   ;;  %s1045_s21 = smov 14   ;;  %s1046_s22 = smov 64  }
  0x39   :  { %v853_v11 = vpack.c.bf16 %v138_v9, %v137_v7  ;;  %v139_v12 = vld [vmem:[#allocation5 + $0x30] sm:$0xff]  ;;  %v140_v13 = vld [vmem:[#allocation5 + $0x38] sm:$0xff]  ;;  %v141_v15 = vld [vmem:[#allocation5 + $0x40] sm:$0xff]  ;;  %s1047_s23 = smov 112   ;;  %vm331_vm4 = vcmask 15360   ;;  %vm339_vm5 = vcmask 31744  }
  0x3a   :  { %848 = vmatpush3.bf16.msra.mxu0 %v847_v4  ;;  %851 = vmatpush3.bf16.msra.mxu1 %v850_v8  ;;  %v856_v14 = vpack.c.bf16 %v140_v13, %v139_v12  ;;  %v142_v16 = vld [vmem:[#allocation5 + $0x48] sm:$0xff]  ;;  %v143_v18 = vld [vmem:[#allocation5 + $0x50] sm:$0xff]  ;;  %v144_v19 = vld [vmem:[#allocation5 + $0x58] sm:$0xff]  ;;  %s1048_s24 = smov 16   ;;  %vm614_vm6 = vcmask 261120   ;;  %s1049_s25 = smov 20  }
  0x3b   :  { %873 = vmatprep.subr.bf16.mxu0 %v1041_v0  ;;  %852 = vmatprep.subr.bf16.mxu1 %v1041_v0  ;;  %v859_v17 = vpack.c.bf16 %v142_v16, %v141_v15  ;;  %v862_v20 = vpack.c.bf16 %v144_v19, %v143_v18  ;;  %v145_v21 = vld [vmem:[#allocation5 + $0x60] sm:$0xff]  ;;  %v146_v22 = vld [vmem:[#allocation5 + $0x68] sm:$0xff]  ;;  %v147_v24 = vld [vmem:[#allocation5 + $0x70] sm:$0xff]  ;;  %s1050_s26 = smov [#allocation8]   ;;  %vm636_vm7 = vcmask 162816   ;;  %vm638_vm8 = vcmask 171008  }
  0x3c   :  { %v865_v23 = vpack.c.bf16 %v146_v22, %v145_v21  ;;  %v148_v25 = vld [vmem:[#allocation5 + $0x78] sm:$0xff]  ;;  %v149_v27 = vld [vmem:[#allocation5 + $0x80] sm:$0xff]  ;;  %v150_v28 = vld [vmem:[#allocation5 + $0x88] sm:$0xff]  ;;  %s646_s27 = sshll.u32 %s1050_s26, 4  ;;  %s647_s27 = int_to_ptr.vmem [resolvable:$true] %s646_s27 }
  0x3d   :  { %731 = vmatmul.mubr.msk.f32.vlgmr.msra.gmra.mrb[0].mxu0 %vm60_vm1, %v1113_v10  ;;  %v868_v26 = vpack.c.bf16 %v148_v25, %v147_v24  ;;  %v871_v29 = vpack.c.bf16 %v150_v28, %v149_v27  ;;  %v227_v30 = vld [vmem:[#allocation5 + $0x90] sm:$0xff]  ;;  %v228_v31 = vld [vmem:[#allocation5 + $0x98] sm:$0xff]  ;;  %v229_v32 = vld [vmem:[#allocation5 + $0xa0] sm:$0xff]  ;;  %s1008_s28 = scalar_lea.vmem %s647_s27, 128  ;;  %p1013_p11 = scmp.lt.s32.totalorder %s647_s27, %s647_s27 }
  0x3e   :  { %784 = vmatprep.mubr.msk.f32.mxu0 %vm1042_vm0, %v1043_v1  ;;  %854 = vmatpush3.bf16.msra.mxu1 %v853_v11  ;;  %v874_v33 = vpack.c.bf16 %v228_v31, %v227_v30  ;;  %v230_v34 = vld [vmem:[#allocation5 + $0xa8] sm:$0xff]  ;;  %v231_v36 = vld [vmem:[#allocation5 + $0xb0] sm:$0xff]  ;;  %v232_v37 = vld [vmem:[#allocation5 + $0xb8] sm:$0xff]  ;;  %p1009_p10 = scmp.ne.s32.totalorder %s647_s27, %s1008_s28  ;;  %p1014_p12 = scmp.lt.s32.totalorder %s1008_s28, %s1008_s28 }
  0x3f   :  { %855 = vmatprep.subr.bf16.mxu1 %v1041_v0  ;;  %v877_v35 = vpack.c.bf16 %v230_v34, %v229_v32  ;;  %v880_v38 = vpack.c.bf16 %v232_v37, %v231_v36  ;;  %v656_v39 = vld [vmem:[#allocation7] ss:$0 sm:$0xff]  ;;  %v234_v45 = vld [vmem:[#allocation5 + $0xc8] sm:$0xff]  ;;  %v658_v47 = vld [vmem:[#allocation7 + $0x1] ss:$0 sm:$0xff] }
  0x40   :  { %875 = vmatpush3.bf16.msra.mxu0 %v874_v33  ;;  %v233_v44 = vld [vmem:[#allocation5 + $0xc0] sm:$0xff]  ;;  %v333_v58 = vld [vmem:[#allocation5 + $0xd0] sm:$0xf]  ;;  %v419_v2 = vld [vmem:[#allocation5 + $0xe8] sm:$0xff]  ;;  %p1015_p13 = por %p1014_p12, %p1013_p11 }
  0x41   :  { %876 = vmatprep.subr.bf16.mxu0 %v1041_v0  ;;  %v883_v46 = vpack.c.bf16 %v234_v45, %v233_v44  ;;  %v659_v52 = vld [vmem:[#allocation7 + $0x2] ss:$0 sm:$0xff]  ;;  %v667_v60 = vld [vmem:[#allocation7 + $0x7] ss:$0 sm:$0xff]  ;;  %v420_v7 = vld [vmem:[#allocation5 + $0xf0] sm:$0xff] }
  0x42   :  { %857 = vmatpush3.bf16.msra.mxu1 %v856_v14  ;;  %v418_v63 = vld [vmem:[#allocation5 + $0xe0] sm:$0xff]  ;;  %v421_v8 = vld [vmem:[#allocation5 + $0xf8] sm:$0xff]  ;;  %v423_v12 = vld [vmem:[#allocation5 + $0x108] sm:$0xff]  ;;  %p1016_p0 = pnand %p1015_p13, %p1009_p10 }
  0x43   :  { %858 = vmatprep.subr.bf16.mxu1 %v1041_v0  ;;  %v886_v5 = vpack.c.bf16 %v419_v2, %v418_v63  ;;  %v889_v11 = vpack.c.bf16 %v421_v8, %v420_v7  ;;  %v424_v14 = vld [vmem:[#allocation5 + $0x110] sm:$0xff]  ;;  %v425_v15 = vld [vmem:[#allocation5 + $0x118] sm:$0xff]  ;;  %v506_v18 = vld [vmem:[#allocation5 + $0x128] sm:$0xff] }
  0x44   :  { %878 = vmatpush3.bf16.msra.mxu0 %v877_v35  ;;  %v895_v16 = vpack.c.bf16 %v425_v15, %v424_v14  ;;  %v507_v19 = vld [vmem:[#allocation5 + $0x130] sm:$0xff]  ;;  %v508_v21 = vld [vmem:[#allocation5 + $0x138] sm:$0xff]  ;;  %v510_v27 = vld [vmem:[#allocation5 + $0x148] sm:$0xff] }
  0x45   :  { %879 = vmatprep.subr.bf16.mxu0 %v1041_v0  ;;  %v511_v32 = vld [vmem:[#allocation5 + $0x150] sm:$0xff]  ;;  %v512_v33 = vld [vmem:[#allocation5 + $0x158] sm:$0xff]  ;;  %v513_v35 = vld [vmem:[#allocation5 + $0x160] sm:$0xff] }
  0x46   :  { %860 = vmatpush3.bf16.msra.mxu1 %v859_v17  ;;  %v505_v17 = vld [vmem:[#allocation5 + $0x120] sm:$0xff]  ;;  %v907_v34 = vpack.c.bf16 %v512_v33, %v511_v32  ;;  %v514_v36 = vld [vmem:[#allocation5 + $0x168] sm:$0xff]  ;;  %v519_v44 = vld [vmem:[#allocation5 + $0x190] sm:$0xff] }
  0x47   :  { %861 = vmatprep.subr.bf16.mxu1 %v1041_v0  ;;  %v910_v37 = vpack.c.bf16 %v514_v36, %v513_v35  ;;  %v520_v45 = vld [vmem:[#allocation5 + $0x198] sm:$0xff] }
  0x48   :  { %881 = vmatpush3.bf16.msra.mxu0 %v880_v38  ;;  %v515_v38 = vld [vmem:[#allocation5 + $0x170] sm:$0xff] }
  0x49   :  { %882 = vmatprep.subr.bf16.mxu0 %v1041_v0 }
  0x4a   :  { %863 = vmatpush3.bf16.msra.mxu1 %v862_v20  ;;  %v661_v20 = vld [vmem:[#allocation7 + $0x3] ss:$0 sm:$0xff] }
  0x4b   :  { %864 = vmatprep.subr.bf16.mxu1 %v1041_v0 }
  0x4c   :  { %884 = vmatpush3.bf16.msra.mxu0 %v883_v46  ;;  %v919_v46 = vpack.c.bf16 %v520_v45, %v519_v44 }
  0x4d   :  { %787 = vmatprep.subr.mxu0 %v1043_v1 }
  0x4e   :  { %866 = vmatpush3.bf16.msra.mxu1 %v865_v23  ;;  %v901_v23 = vpack.c.bf16 %v508_v21, %v507_v19 }
  0x4f   :  { %867 = vmatprep.subr.bf16.mxu1 %v1041_v0 }
  0x52   :  { %869 = vmatpush3.bf16.msra.mxu1 %v868_v26  ;;  %v509_v26 = vld [vmem:[#allocation5 + $0x140] sm:$0xff] }
  0x53   :  { %870 = vmatprep.subr.bf16.mxu1 %v1041_v0  ;;  %v904_v30 = vpack.c.bf16 %v510_v27, %v509_v26 }
  0x56   :  { %872 = vmatpush3.bf16.msra.mxu1 %v871_v29 }
  0x57   :  { %897 = vmatprep.subr.bf16.mxu1 %v1041_v0 }
 0x110   :  { %v130_v40 = vpop.f32.mrb[0].mxu0 }
 0x111   :  { %v131_v41 = vadd.f32 %v656_v39, %v130_v40  ;;  %v732_v42 = vpop.f32.mrb[1].mxu0  ;;  %v516_v39 = vld [vmem:[#allocation5 + $0x178] sm:$0xff] }
 0x112   :  { %v913_v40 = vpack.c.bf16 %v516_v39, %v515_v38  ;;  %v518_v42 = vld [vmem:[#allocation5 + $0x188] sm:$0xff] }
 0x113   :  { %v134_v43 = vmax.f32 %v131_v41, 0.0  ;;  %v517_v41 = vld [vmem:[#allocation5 + $0x180] sm:$0xff] }
 0x115   :  { %766 = vmatmul.mubr.f32.vlgmr.msra.gmra.mrb[0].mxu1 %v134_v43  ;;  %v916_v43 = vpack.c.bf16 %v518_v42, %v517_v41 }
 0x116   :  { %843 = vmatprep.mubr.msk.f32.mxu1 %vm1042_vm0, %v1043_v1 }
 0x1e8   :  { %v222_v48 = vpop.f32.mrb[0].mxu1 }
 0x1e9   :  { %v223_v49 = vadd.f32 %v658_v47, %v222_v48  ;;  %v767_v50 = vpop.f32.mrb[1].mxu1 }
 0x1eb   :  { %v226_v51 = vmax.f32 %v223_v49, 0.0  ;;  %v664_v49 = vld [vmem:[#allocation7 + $0x4] ss:$0 sm:$0xff] }
 0x1ed   :  { %785 = vmatmul.mubr.msk.f32.vlgmr.msra.gmra.mrb[2].mxu0 %vm240_vm2, %v226_v51 }
 0x1ee   :  { %789 = vmatprep.mubr.msk.f32.mxu0 %vm1042_vm0, %v1043_v1  ;;  %788 = vmatpush3.msk.msra.mxu0 %vm343_vm3, %v333_v58 }
 0x1ef   :  { %885 = vmatprep.subr.bf16.mxu0 %v1041_v0 }
 0x2c0   :  { %v310_v53 = vpop.f32.mrb[2].mxu0 }
 0x2c1   :  { %v1137_v54 = vadd.f32 %v659_v52, %v310_v53  ;;  %v786_v55 = vpop.f32.mrb[3].mxu0 }
 0x2c3   :  { %v314_v56 = vmul.f32 0.5, %v1137_v54  ;;  %328 = vrot.lane.b32.xlu1 %v1137_v54, %s1044_s2 }
 0x2c5   :  { %v315_v57 = vmul.f32 1.442695, %v314_v56 }
 0x2c7   :  { %936 = vpow2.f32 %v315_v57  ;;  %606 = vrot.lane.b32.xlu1 %v667_v60, %s1046_s22  ;;  %v666_v60 = vld [vmem:[#allocation7 + $0x5] ss:$0 sm:$0xff] }
 0x2d1   :  { %v937_v59 = vpop.eup %936 }
 0x2d2   :  { %318 = vrot.lane.b32.xlu0 %v937_v59, %s1045_s21 }
 0x335   :  { %v329_v6 = vpop.permute.xlu1 %328 }
 0x339   :  { %v607_v28 = vpop.permute.xlu1 %606 }
 0x344   :  { %v319_v61 = vpop.permute.xlu0 %318 }
 0x345   :  { %v321_v62 = vmul.f32 %v319_v61, %v1113_v10  ;;  %v422_v10 = vld [vmem:[#allocation5 + $0x100] sm:$0xff] }
 0x346   :  { %v892_v13 = vpack.c.bf16 %v423_v12, %v422_v10 }
 0x347   :  { %323 = vrot.lane.b32.xlu0 %v321_v62, %s1047_s23 }
 0x3b9   :  { %v324_v3 = vpop.permute.xlu0 %323 }
 0x3ba   :  { %v326_v4 = vadd.f32 %v324_v3, %v1137_v54 }
 0x3bc   :  { %v332_v9 = vsel %vm331_vm4, %v326_v4, %v329_v6 }
 0x3bd   :  { %790 = vmatmul.mubr.msk.f32.vlgmr.msra.gmra.mrb[4].mxu0 %vm339_vm5, %v332_v9 }
 0x3be   :  { %887 = vmatpush3.bf16.msra.mxu0 %v886_v5  ;;  %808 = vmatprep.mubr.msk.f32.mxu0 %vm1042_vm0, %v1043_v1  ;;  %v898_v1 = vpack.c.bf16 %v506_v18, %v505_v17 }
 0x3bf   :  { %888 = vmatprep.subr.bf16.mxu0 %v1041_v0 }
 0x3c0   :  { %899 = vmatpush3.bf16.msra.mxu1 %v898_v1 }
 0x3c1   :  { %900 = vmatprep.subr.bf16.mxu1 %v1041_v0 }
 0x3c2   :  { %890 = vmatpush3.bf16.msra.mxu0 %v889_v11 }
 0x3c3   :  { %891 = vmatprep.subr.bf16.mxu0 %v1041_v0 }
 0x3c4   :  { %902 = vmatpush3.bf16.msra.mxu1 %v901_v23 }
 0x3c5   :  { %903 = vmatprep.subr.bf16.mxu1 %v1041_v0 }
 0x3c6   :  { %893 = vmatpush3.bf16.msra.mxu0 %v892_v13 }
 0x3c7   :  { %894 = vmatprep.subr.bf16.mxu0 %v1041_v0 }
 0x3c8   :  { %905 = vmatpush3.bf16.msra.mxu1 %v904_v30 }
 0x3c9   :  { %906 = vmatprep.subr.bf16.mxu1 %v1041_v0 }
 0x3ca   :  { %896 = vmatpush3.bf16.msra.mxu0 %v895_v16 }
 0x3cc   :  { %908 = vmatpush3.bf16.msra.mxu1 %v907_v34 }
 0x3cd   :  { %909 = vmatprep.subr.bf16.mxu1 %v1041_v0 }
 0x3d0   :  { %911 = vmatpush3.bf16.msra.mxu1 %v910_v37 }
 0x3d1   :  { %912 = vmatprep.subr.bf16.mxu1 %v1041_v0 }
 0x3d4   :  { %914 = vmatpush3.bf16.msra.mxu1 %v913_v40 }
 0x3d5   :  { %915 = vmatprep.subr.bf16.mxu1 %v1041_v0 }
 0x3d8   :  { %917 = vmatpush3.bf16.msra.mxu1 %v916_v43 }
 0x3d9   :  { %918 = vmatprep.subr.bf16.mxu1 %v1041_v0 }
 0x3dc   :  { %920 = vmatpush3.bf16.msra.mxu1 %v919_v46 }
 0x490   :  { %v413_v22 = vpop.f32.mrb[4].mxu0 }
 0x491   :  { %v414_v24 = vadd.f32 %v661_v20, %v413_v22  ;;  %v791_v25 = vpop.f32.mrb[5].mxu0 }
 0x493   :  { %v417_v29 = vmax.f32 %v414_v24, 0.0 }
 0x495   :  { %v609_v31 = vmul.f32 %v607_v28, %v417_v29  ;;  %809 = vmatmul.mubr.msk.f32.vlgmr.msra.gmra.mrb[6].mxu0 %vm240_vm2, %v417_v29 }
 0x497   :  { %611 = vrot.lane.b32.xlu0 %v609_v31, %s1046_s22 }
 0x49b   :  { %628 = vrot.lane.b32.xlu0 %v1137_v54, %s1048_s24  ;;  %v668_v54 = vld [vmem:[#allocation7 + $0x6] ss:$0 sm:$0xff] }
 0x509   :  { %v612_v47 = vpop.permute.xlu0 %611 }
 0x50a   :  { %v615_v48 = vsel %vm614_vm6, %v612_v47, 0.0 }
 0x50b   :  { %616 = vadd.xlane.f32.xlu1 %v615_v48 }
 0x50d   :  { %v629_v4 = vpop.permute.xlu0 %628 }
 0x568   :  { %v500_v50 = vpop.f32.mrb[6].mxu0 }
 0x569   :  { %v501_v51 = vadd.f32 %v664_v49, %v500_v50  ;;  %v810_v52 = vpop.f32.mrb[7].mxu0 }
 0x56b   :  { %v504_v53 = vmax.f32 %v501_v51, 0.0 }
 0x56d   :  { %844 = vmatmul.mubr.f32.vlgmr.msra.gmra.mrb[2].mxu1 %v504_v53 }
 0x598   :  { %v617_v55 = vpop.xlane.xlu1 %616 }
 0x599   :  { %v623_v56 = vadd.f32 %v668_v54, %v617_v55 }
 0x59b   :  { %v624_v57 = vmul.f32 0.5, %v623_v56 }
 0x59d   :  { %938 = vtanh.f32 %v624_v57 }
 0x5a7   :  { %v939_v0 = vpop.eup %938 }
 0x5a8   :  { %v626_v58 = vmul.f32 0.5, %v939_v0 }
 0x5aa   :  { %v627_v59 = vadd.f32 0.5, %v626_v58 }
 0x5ac   :  { %632 = vrot.lane.b32.xlu0 %v627_v59, %s1049_s25 }
 0x61e   :  { %v633_v7 = vpop.permute.xlu0 %632 }
 0x640   :  { %v592_v61 = vpop.f32.mrb[2].mxu1 }
 0x641   :  { %v593_v62 = vadd.f32 %v666_v60, %v592_v61  ;;  %v845_v63 = vpop.f32.mrb[3].mxu1 }
 0x643   :  { %v596_v2 = vmul.f32 0.5, %v593_v62 }
 0x645   :  { %940 = vtanh.f32 %v596_v2 }
 0x64f   :  { %v941_v3 = vpop.eup %940 }
 0x650   :  { %v598_v5 = vmul.f32 0.5, %v941_v3 }
 0x652   :  { %v599_v6 = vadd.f32 0.5, %v598_v5 }
 0x654   :  { %v635_v8 = vsel %vm60_vm1, %v599_v6, %v629_v4 }
 0x655   :  { %v637_v9 = vsel %vm636_vm7, %v635_v8, %v633_v7 }
 0x656   :  { %639 = vst.msk [vmem:[#allocation8] sm:$0xff] %vm638_vm8, %v637_v9 }
 0x657   :  { %1019 = shalt.err (!%p1016_p0)
}
 0x658   :  { %s1020_s4 = scalar_lea.hbm %s1176_s3, 128 }
 0x659   :  { %p1021_p1 = scmp.ne.s32.totalorder %s1176_s3, %s1020_s4  ;;  %p1024_p2 = scmp.lt.u32.totalorder %s1020_s4, %s1176_s3 }
 0x65b   :  { %p1026_p3 = pnand %p1024_p2, %p1021_p1 }
 0x65d   :  { %1029 = shalt.err (!%p1026_p3)
}
 0x65e   :  { %649 = dma.vmem_to_hbm [thread:$0]  %s647_s27, 128, %s1176_s3, [#allocation4]  }
 0x65f   :  { %1034 = dma.done.wait [#allocation4], 128  }
 0x660   :  { %1035 = vsyncadd [#allocation4], 4294967168 }
 0x661   :  { %653 = vsyncpa [#allocation3], 1 }
 0x662   :  { %654 = vsyncpa [#allocation6], 1 }
 0x663   :  { %655 = vsyncpa [#allocation4], 1 }

</bundles_post_ra>
